<compile_context>
chip_gen: v7x
topology: tpu7x:2x2x1
jax: 0.10.0
libtpu: 0.0.40
codegen_flags: <defaults>
</compile_context>

<pallas_src>
import functools
import math

import jax
import jax.numpy as jnp
from jax.experimental import pallas as pl
from jax.experimental.pallas import tpu as pltpu

_LANE = 128      # lane width: output-feature padding target
_SUBLANE = 8     # sublane width: batch padding granularity


def _round_up(x, m):
    return ((x + m - 1) // m) * m


def _mlp_kernel(x_ref, *refs, num_layers):
    """Fused MLP on one batch tile: h = ReLU(h @ W_l + b_l) for l < L-1,
    final layer without ReLU.  Weight out-dims are lane-dense (padded to 128);
    the first reduction dim is the true input width (no K padding)."""
    o_ref = refs[-1]
    param_refs = refs[:-1]
    h = x_ref[...]
    for l in range(num_layers):
        w_ref = param_refs[2 * l]
        b_ref = param_refs[2 * l + 1]          # (1, out_pad) f32 -> broadcasts
        # f32 accumulate/epilogue regardless of weight dtype (bf16-safe path).
        h = jnp.dot(h.astype(w_ref.dtype), w_ref[...],
                    preferred_element_type=jnp.float32) + b_ref[...]
        if l < num_layers - 1:
            h = jnp.maximum(h, 0.0)
    o_ref[...] = h.astype(o_ref.dtype)


def init_net_uniform(key, layers):
    """Replicates Net_Uniform.__init__:
       weight ~ U(0, 1) (shape (out, in), as in nn.Linear)
       bias   ~ U(-1/sqrt(in), 1/sqrt(in)) (PyTorch default, untouched)."""
    params = []
    for in_size, out_size in zip(layers, layers[1:]):
        key, kw, kb = jax.random.split(key, 3)
        w = jax.random.uniform(kw, (out_size, in_size), jnp.float32, 0.0, 1.0)
        bound = 1.0 / math.sqrt(in_size)
        b = jax.random.uniform(kb, (out_size,), jnp.float32, -bound, bound)
        params.append((w, b))
    return params


def prepare_params(params, dtype=jnp.float32):
    """One-time preprocessing (outside the forward hot path):
       * transpose W to (in, out),
       * zero-pad ONLY output dims to multiples of 128 (lane-dense matmuls);
         the first layer's reduction dim stays at the true input width, later
         layers' reduction dims match the previous layer's padded output,
       * biases stay f32 (f32 epilogue even when weights are bf16)."""
    prepared = []
    prev_out_pad = None
    for idx, (w, b) in enumerate(params):
        out_size, in_size = w.shape
        in_pad = in_size if idx == 0 else prev_out_pad
        out_pad = _round_up(out_size, _LANE)
        w_t = (jnp.zeros((in_pad, out_pad), dtype)
               .at[:in_size, :out_size].set(w.T.astype(dtype)))
        b_p = jnp.zeros((1, out_pad), jnp.float32).at[0, :out_size].set(b)
        prepared.append((w_t, b_p))
        prev_out_pad = out_pad
    return prepared


@functools.partial(jax.jit,
                   static_argnames=("layers", "batch_tile", "out_dtype"))
def net_uniform_forward(prepared_params, x, *, layers, batch_tile=512,
                        out_dtype=None):
    """x: (B, Din) -> logits (B, layers[-1]).  Single fused pallas_call."""
    B, Din = x.shape
    num_layers = len(prepared_params)
    out_features = layers[-1]
    out_pad = prepared_params[-1][0].shape[1]
    if out_dtype is None:
        # At large B the padded (tb, 128) logit write is the biggest HBM
        # stream; pass out_dtype=jnp.bfloat16 to halve it if it matters.
        out_dtype = x.dtype

    # --- batch tiling --------------------------------------------------------
    tb = min(batch_tile, _round_up(B, _SUBLANE))
    # v7x has 2 TensorCores: give the 'parallel' grid axis >= 2 steps once the
    # batch is big enough to split (harmless on single-TC v5e/v6e).
    if tb >= 2 * _SUBLANE and _round_up(B, tb) // tb < 2:
        tb = _round_up(-(-B // 2), _SUBLANE)
    b_pad = _round_up(B, tb)

    # No reduction-dim padding of x; pad batch rows only when needed.
    if b_pad != B:
        x_in = jnp.zeros((b_pad, Din), x.dtype).at[:B, :].set(x)
    else:
        x_in = x

    grid = (b_pad // tb,)
    in_specs = [pl.BlockSpec((tb, Din), lambda i: (i, 0))]
    flat_params = []
    param_bytes = 0
    for w, b in prepared_params:
        # Full-extent, grid-invariant blocks: weights stay resident in VMEM.
        # TODO(synk): at production widths use pipeline_mode=pl.Buffered(1)
        # on these constant-index blocks (halves resident weight VMEM) and/or
        # tile the K/N dims so the layer fits v7x's 64 MiB VMEM.
        in_specs.append(pl.BlockSpec(w.shape, lambda i: (0, 0)))
        in_specs.append(pl.BlockSpec(b.shape, lambda i: (0, 0)))
        flat_params.extend([w, b])
        param_bytes += w.size * w.dtype.itemsize + b.size * b.dtype.itemsize
    out_specs = pl.BlockSpec((tb, out_pad), lambda i: (i, 0))

    # Cost estimate from the TRUE (unpadded) dims.
    flops = sum(2 * B * i * o for i, o in zip(layers, layers[1:]))
    bytes_accessed = (B * Din * x.dtype.itemsize
                      + param_bytes
                      + B * out_features * jnp.dtype(out_dtype).itemsize)
    cost = pl.CostEstimate(flops=flops, transcendentals=0,
                           bytes_accessed=bytes_accessed)

    # Explicit scoped-VMEM budget: resident (double-buffered) weights + the
    # double-buffered x/out tiles + slack, floored at 32 MiB (v5e's default is
    # only 16 MiB) and capped at v7x's 64 MiB physical VMEM.
    vmem_need = (2 * param_bytes
                 + 2 * tb * Din * x.dtype.itemsize
                 + 2 * tb * out_pad * jnp.dtype(out_dtype).itemsize
                 + (1 << 20))
    vmem_limit = int(min(max(vmem_need, 32 * 1024 * 1024), 64 * 1024 * 1024))

    kernel = functools.partial(_mlp_kernel, num_layers=num_layers)
    out_p = pl.pallas_call(
        kernel,
        out_shape=jax.ShapeDtypeStruct((b_pad, out_pad), out_dtype),
        grid_spec=pl.GridSpec(grid=grid, in_specs=in_specs,
                              out_specs=out_specs),
        compiler_params=pltpu.CompilerParams(
            dimension_semantics=("parallel",),
            vmem_limit_bytes=vmem_limit),
        cost_estimate=cost,
    )(x_in, *flat_params)

    # Slice away batch padding and lane padding (padded cols are exactly zero
    # by construction, padded rows are dropped).
    return out_p[:B, :out_features]


if __name__ == "__main__":
    key = jax.random.PRNGKey(0)
    layers = (32, 64, 32, 10)   # small Layers list consistent with the module
    batch = 24                  # exercises batch padding + a 2-step grid

    params = init_net_uniform(key, layers)   # PyTorch-layout params
    prepared = prepare_params(params)        # one-time transpose + lane pad

    key, kx = jax.random.split(key)
    x = jax.random.normal(kx, (batch, layers[0]), jnp.float32)

    out = net_uniform_forward(prepared, x, layers=layers)
    jax.block_until_ready(out)

    # Reference check against plain-JAX nn.Linear semantics.
    ref = x
    for l, (w, b) in enumerate(params):
        ref = ref @ w.T + b
        if l < len(params) - 1:
            ref = jnp.maximum(ref, 0.0)
    assert out.shape == (batch, layers[-1]), out.shape
    assert jnp.allclose(out, ref, atol=1e-4, rtol=1e-4), \
        float(jnp.max(jnp.abs(out - ref)))
    print("KERNEL_OK")
</pallas_src>

<mosaic_0001>
module attributes {stable_mosaic.version = 11 : i64} {
  func.func @_mlp_kernel(%arg0: i32, %arg1: memref<16x32xf32, #tpu.memory_space<vmem>>, %arg2: memref<32x128xf32, #tpu.memory_space<vmem>>, %arg3: memref<1x128xf32, #tpu.memory_space<vmem>>, %arg4: memref<128x128xf32, #tpu.memory_space<vmem>>, %arg5: memref<1x128xf32, #tpu.memory_space<vmem>>, %arg6: memref<128x128xf32, #tpu.memory_space<vmem>>, %arg7: memref<1x128xf32, #tpu.memory_space<vmem>>, %arg8: memref<16x128xf32, #tpu.memory_space<vmem>>) attributes {dimension_semantics = [#tpu.dimension_semantics<parallel>], iteration_bounds = array<i64: 2>, scalar_prefetch = 0 : i64, scratch_operands = 0 : i64, tpu.core_type = #tpu.core_type<tc>, window_params = [{transform_indices = @transform_0, window_bounds = array<i64: 16, 32>}, {pipeline_mode = #tpu.pipeline_mode<synchronous>, transform_indices = @transform_1, window_bounds = array<i64: 32, 128>}, {pipeline_mode = #tpu.pipeline_mode<synchronous>, transform_indices = @transform_2, window_bounds = array<i64: 1, 128>}, {pipeline_mode = #tpu.pipeline_mode<synchronous>, transform_indices = @transform_3, window_bounds = array<i64: 128, 128>}, {pipeline_mode = #tpu.pipeline_mode<synchronous>, transform_indices = @transform_4, window_bounds = array<i64: 1, 128>}, {pipeline_mode = #tpu.pipeline_mode<synchronous>, transform_indices = @transform_5, window_bounds = array<i64: 128, 128>}, {pipeline_mode = #tpu.pipeline_mode<synchronous>, transform_indices = @transform_6, window_bounds = array<i64: 1, 128>}, {transform_indices = @transform_7, window_bounds = array<i64: 16, 128>}]} {
    %c0 = arith.constant 0 : index
    %c0_0 = arith.constant 0 : index
    %0 = vector.load %arg1[%c0, %c0_0] : memref<16x32xf32, #tpu.memory_space<vmem>>, vector<16x32xf32>
    %c0_1 = arith.constant 0 : index
    %c0_2 = arith.constant 0 : index
    %1 = vector.load %arg2[%c0_1, %c0_2] : memref<32x128xf32, #tpu.memory_space<vmem>>, vector<32x128xf32>
    %cst = arith.constant dense<0.000000e+00> : vector<16x128xf32>
    %2 = tpu.matmul %0, %1, %cst {dimension_numbers = #tpu.dot_dimension_numbers<[1], [0], [0], [1], [0, 0, 1, 1], [], []>} : vector<16x32xf32>, vector<32x128xf32>, vector<16x128xf32> -> vector<16x128xf32>
    %c0_3 = arith.constant 0 : index
    %c0_4 = arith.constant 0 : index
    %3 = vector.load %arg3[%c0_3, %c0_4] : memref<1x128xf32, #tpu.memory_space<vmem>>, vector<1x128xf32>
    %4 = vector.broadcast %3 : vector<1x128xf32> to vector<16x128xf32>
    %5 = arith.addf %2, %4 : vector<16x128xf32>
    %cst_5 = arith.constant 0.000000e+00 : f32
    %6 = vector.broadcast %cst_5 : f32 to vector<16x128xf32>
    %7 = arith.maximumf %5, %6 : vector<16x128xf32>
    %c0_6 = arith.constant 0 : index
    %c0_7 = arith.constant 0 : index
    %8 = vector.load %arg4[%c0_6, %c0_7] : memref<128x128xf32, #tpu.memory_space<vmem>>, vector<128x128xf32>
    %cst_8 = arith.constant dense<0.000000e+00> : vector<16x128xf32>
    %9 = tpu.matmul %7, %8, %cst_8 {dimension_numbers = #tpu.dot_dimension_numbers<[1], [0], [0], [1], [0, 0, 1, 1], [], []>} : vector<16x128xf32>, vector<128x128xf32>, vector<16x128xf32> -> vector<16x128xf32>
    %c0_9 = arith.constant 0 : index
    %c0_10 = arith.constant 0 : index
    %10 = vector.load %arg5[%c0_9, %c0_10] : memref<1x128xf32, #tpu.memory_space<vmem>>, vector<1x128xf32>
    %11 = vector.broadcast %10 : vector<1x128xf32> to vector<16x128xf32>
    %12 = arith.addf %9, %11 : vector<16x128xf32>
    %cst_11 = arith.constant 0.000000e+00 : f32
    %13 = vector.broadcast %cst_11 : f32 to vector<16x128xf32>
    %14 = arith.maximumf %12, %13 : vector<16x128xf32>
    %c0_12 = arith.constant 0 : index
    %c0_13 = arith.constant 0 : index
    %15 = vector.load %arg6[%c0_12, %c0_13] : memref<128x128xf32, #tpu.memory_space<vmem>>, vector<128x128xf32>
    %cst_14 = arith.constant dense<0.000000e+00> : vector<16x128xf32>
    %16 = tpu.matmul %14, %15, %cst_14 {dimension_numbers = #tpu.dot_dimension_numbers<[1], [0], [0], [1], [0, 0, 1, 1], [], []>} : vector<16x128xf32>, vector<128x128xf32>, vector<16x128xf32> -> vector<16x128xf32>
    %c0_15 = arith.constant 0 : index
    %c0_16 = arith.constant 0 : index
    %17 = vector.load %arg7[%c0_15, %c0_16] : memref<1x128xf32, #tpu.memory_space<vmem>>, vector<1x128xf32>
    %18 = vector.broadcast %17 : vector<1x128xf32> to vector<16x128xf32>
    %19 = arith.addf %16, %18 : vector<16x128xf32>
    %c0_17 = arith.constant 0 : index
    %c0_18 = arith.constant 0 : index
    %20 = vector.load %arg8[%c0_17, %c0_18] : memref<16x128xf32, #tpu.memory_space<vmem>>, vector<16x128xf32>
    tpu.vector_store %arg8[%c0_17, %c0_18], %19 {strides = array<i32>} : memref<16x128xf32, #tpu.memory_space<vmem>>, vector<16x128xf32>,
    return
  }
  func.func @transform_0(%arg0: i32) -> (i32, i32) {
    %c0_i32 = arith.constant 0 : i32
    %c0_i32_0 = arith.constant 0 : i32
    return %arg0, %c0_i32 : i32, i32
  }
  func.func @transform_1(%arg0: i32) -> (i32, i32) {
    %c0_i32 = arith.constant 0 : i32
    %c0_i32_0 = arith.constant 0 : i32
    %c0_i32_1 = arith.constant 0 : i32
    return %c0_i32, %c0_i32_0 : i32, i32
  }
  func.func @transform_2(%arg0: i32) -> (i32, i32) {
    %c0_i32 = arith.constant 0 : i32
    %c0_i32_0 = arith.constant 0 : i32
    %c0_i32_1 = arith.constant 0 : i32
    return %c0_i32, %c0_i32_0 : i32, i32
  }
  func.func @transform_3(%arg0: i32) -> (i32, i32) {
    %c0_i32 = arith.constant 0 : i32
    %c0_i32_0 = arith.constant 0 : i32
    %c0_i32_1 = arith.constant 0 : i32
    return %c0_i32, %c0_i32_0 : i32, i32
  }
  func.func @transform_4(%arg0: i32) -> (i32, i32) {
    %c0_i32 = arith.constant 0 : i32
    %c0_i32_0 = arith.constant 0 : i32
    %c0_i32_1 = arith.constant 0 : i32
    return %c0_i32, %c0_i32_0 : i32, i32
  }
  func.func @transform_5(%arg0: i32) -> (i32, i32) {
    %c0_i32 = arith.constant 0 : i32
    %c0_i32_0 = arith.constant 0 : i32
    %c0_i32_1 = arith.constant 0 : i32
    return %c0_i32, %c0_i32_0 : i32, i32
  }
  func.func @transform_6(%arg0: i32) -> (i32, i32) {
    %c0_i32 = arith.constant 0 : i32
    %c0_i32_0 = arith.constant 0 : i32
    %c0_i32_1 = arith.constant 0 : i32
    return %c0_i32, %c0_i32_0 : i32, i32
  }
  func.func @transform_7(%arg0: i32) -> (i32, i32) {
    %c0_i32 = arith.constant 0 : i32
    %c0_i32_0 = arith.constant 0 : i32
    return %arg0, %c0_i32 : i32, i32
  }
}

</mosaic_0001>

<bundles_post_ra>
// kernel: net_uniform_forward.1
= control target key start
LH: loop header
LB: loop body
LE: loop exit
PB: predicated region body
PF: predicated region fallthrough
CT: control target
= control target key end

     0   :  { %12 = vsyncpa [#allocation3], 0  ;;  %s1175_s0 = inlined_call_operand.vmem [shape: f32[32,32], index: 0, kind: input, shape index: {}]   ;;  %s1176_s1 = inlined_call_operand.vmem [shape: f32[32,128], index: 1, kind: input, shape index: {}]   ;;  %s1177_s2 = inlined_call_operand.vmem [shape: f32[1,128], index: 2, kind: input, shape index: {}]   ;;  %s1178_s3 = inlined_call_operand.hbm [shape: f32[128,128], index: 3, kind: input, shape index: {}]   ;;  %s1179_s4 = inlined_call_operand.vmem [shape: f32[1,128], index: 4, kind: input, shape index: {}]   ;;  %s1180_s5 = inlined_call_operand.hbm [shape: f32[128,128], index: 5, kind: input, shape index: {}]   ;;  %s1181_s6 = inlined_call_operand.vmem [shape: f32[1,128], index: 6, kind: input, shape index: {}]   ;;  %s1182_s7 = inlined_call_operand.vmem [shape: f32[32,128], index: 7, kind: output, shape index: {}]  }
   0x1   :  { %13 = vsyncpa [#allocation5], 0  ;;  %s1049_s24 = smov 0  }
   0x2 LB: > { %s687_s25 = sadd.s32 4294967295, %s1003_s24   ;;  %p689_p0 = scmp.ge.s32.totalorder %s1003_s24, 1  ;;  %s1003_s24 = sphi %s1049_s24, %s19_s24  }
   0x3   : > { %p202_p1 = scmp.lt.s32.totalorder %s1003_s24, 3  ;;  %s1005_s26 = smov [#allocation2]  }
   0x4   : > { %s220_s27 = sshll.u32 %s1005_s26, 4  ;;  %p1063_p3 = scmp.eq.s32.totalorder %s687_s25, 0  ;;  %s221_s27 = int_to_ptr.vmem [resolvable:$true] %s220_s27 }
   0x5   : > { %p1057_p2 = pnand %p689_p0, %p202_p1  ;;  %s1006_s30 = smov [#allocation4]  }
   0x6   : > { %s1187_s29 = scalar_select %p1063_p3, 1, 0 }
   0x7   : > { %s1186_s28 = scalar_select %p1057_p2, 1, 0 }
   0x8   : > { %p910_p4 = pneg %p1057_p2  ;;  %s236_s8 = sshll.u32 %s1006_s30, 4  ;;  %s1075_s8 = int_to_ptr.vmem [resolvable:$true] %s236_s8 }
   0x9   : > { %s933_s12 = scalar_lea.hbm %s1178_s3, 2048 }
   0xa   : > { %p1071_p5 = pnand %p1063_p3, %p910_p4  ;;  %p934_p6 = scmp.ne.s32.totalorder %s1178_s3, %s933_s12 }
   0xb   : > { %p940_p10 = scmp.lt.u32.totalorder %s933_s12, %s1178_s3 }
   0xc   : > { %p935_p7 = pneg %p1071_p5 }
   0xe   : > { %p936_p8 = pnand %p935_p7, %p934_p6 }
  0x10   : > { %p937_p9 = pneg %p936_p8 }
  0x12   : > { %p942_p11 = pnand %p940_p10, %p937_p9 }
  0x14   : > { %945 = shalt.err (!%p942_p11)
}
  0x15   : > { %s946_s17 = scalar_lea.vmem %s221_s27, 2048  ;;  %p954_p1 = scmp.lt.s32.totalorder %s221_s27, %s221_s27 }
  0x16   : > { %p947_p12 = scmp.ne.s32.totalorder %s221_s27, %s946_s17  ;;  %p955_p4 = scmp.lt.s32.totalorder %s946_s17, %s946_s17 }
  0x18   : > { %p949_p13 = pnand %p947_p12, %p935_p7  ;;  %p956_p3 = por %p955_p4, %p954_p1 }
  0x1a   : > { %p950_p0 = pneg %p949_p13 }
  0x1c   : > { %p957_p2 = pnand %p956_p3, %p950_p0 }
  0x1e   : > { %960 = shalt.err (!%p957_p2)
}
  0x1f   : > { %s1007_s18 = smov 128   ;;  %s1008_s19 = smov 8  }
  0x20   : > { %913 = dma.hbm_to_vmem [thread:$0]  (!%p1071_p5), %s1178_s3, 2048, %s221_s27, [#allocation3], %s1007_s18, %s1007_s18, %s1008_s19  }
  0x21   : > { %s961_s26 = scalar_lea.hbm %s1180_s5, 2048 }
  0x22   : > { %p962_p6 = scmp.ne.s32.totalorder %s1180_s5, %s961_s26  ;;  %p968_p8 = scmp.lt.u32.totalorder %s961_s26, %s1180_s5 }
  0x24   : > { %p964_p2 = pnand %p962_p6, %p935_p7 }
  0x26   : > { %p965_p3 = pneg %p964_p2 }
  0x28   : > { %p970_p9 = pnand %p968_p8, %p965_p3 }
  0x2a   : > { %973 = shalt.err (!%p970_p9)
}
  0x2b   : > { %s974_s27 = scalar_lea.vmem %s1075_s8, 2048  ;;  %p982_p13 = scmp.lt.s32.totalorder %s1075_s8, %s1075_s8 }
  0x2c   : > { %p975_p10 = scmp.ne.s32.totalorder %s1075_s8, %s974_s27  ;;  %p983_p0 = scmp.lt.s32.totalorder %s974_s27, %s974_s27 }
  0x2e   : > { %p977_p11 = pnand %p975_p10, %p935_p7  ;;  %p984_p1 = por %p983_p0, %p982_p13 }
  0x30   : > { %p978_p12 = pneg %p977_p11 }
  0x32   : > { %p985_p4 = pnand %p984_p1, %p978_p12 }
  0x34   : > { %988 = shalt.err (!%p985_p4)
}
  0x35   : > { %916 = dma.hbm_to_vmem [thread:$0]  (!%p1071_p5), %s1180_s5, 2048, %s1075_s8, [#allocation5], %s1007_s18, %s1007_s18, %s1008_s19  }
  0x36   : > { %p1189_p6 = scmp.ne.s32.totalorder %s1186_s28, 0 }
  0x37   : > { %p1190_p2 = scmp.ne.s32.totalorder (!%p1189_p6), %s1187_s29, 0 }
  0x38   : > { %264 = sbr.rel (%p1189_p6) target bundleno = 729 (0x2d9), region = 48 }
  0x3f   : > { %994 = dma.done.wait (%p1190_p2), [#allocation3], 2048  }
  0x40   : > { %996 = vsyncadd (%p1190_p2), [#allocation3], 4294965248 }
  0x41   : > { %998 = dma.done.wait (%p1190_p2), [#allocation5], 2048  }
  0x42   : > { %1000 = vsyncadd (%p1190_p2), [#allocation5], 4294965248  ;;  %s696_s9 = sshll.u32 %s687_s25, 1  ;;  %vm325_vm0 = vcmask 261120   ;;  %v314_v0 = vld [vmem:[%s1176_s1] sm:$0xff]  ;;  %v315_v1 = vld [vmem:[%s1176_s1 + $0x8] sm:$0xff] }
  0x43   : > { %p301_p7 = scmp.lt.s32.totalorder %s696_s9, 3  ;;  %v316_v2 = vld [vmem:[%s1176_s1 + $0x10] sm:$0xff]  ;;  %v830_v3 = vpack.c.bf16 %v315_v1, %v314_v0  ;;  %v317_v4 = vld [vmem:[%s1176_s1 + $0x18] sm:$0xff]  ;;  %v409_v7 = vld [vmem:[#allocation2] sm:$0xff] }
  0x44   : > { %v834_v6 = vpack.c.bf16 %v317_v4, %v316_v2  ;;  %v410_v8 = vld [vmem:[#allocation2 + $0x8] sm:$0xff]  ;;  %v411_v9 = vld [vmem:[#allocation2 + $0x10] sm:$0xff]  ;;  %v412_v11 = vld [vmem:[#allocation2 + $0x18] sm:$0xff] }
  0x45   : > { %s1192_s9 = smov (!%p301_p7, %s696_s9), 3  ;;  %831 = vmatprep.subr.bf16.mxu0 %v830_v3  ;;  %v838_v10 = vpack.c.bf16 %v410_v8, %v409_v7  ;;  %v842_v12 = vpack.c.bf16 %v412_v11, %v411_v9  ;;  %v413_v13 = vld [vmem:[#allocation2 + $0x20] sm:$0xff]  ;;  %v414_v14 = vld [vmem:[#allocation2 + $0x28] sm:$0xff]  ;;  %v415_v17 = vld [vmem:[#allocation2 + $0x30] sm:$0xff] }
  0x46   : > { %s697_s28 = sshll.u32 %s1192_s9, 3  ;;  %833 = vmatpush3.bf16.msra.mxu0 %v830_v3  ;;  %v846_v15 = vpack.c.bf16 %v414_v14, %v413_v13  ;;  %v416_v18 = vld [vmem:[#allocation2 + $0x38] sm:$0xff]  ;;  %v417_v20 = vld [vmem:[#allocation2 + $0x40] sm:$0xff]  ;;  %v418_v21 = vld [vmem:[#allocation2 + $0x48] sm:$0xff] }
  0x47   : > { %s304_s16 = scalar_lea.vmem %s1175_s0, %s697_s28  ;;  %835 = vmatprep.subr.bf16.mxu0 %v834_v6  ;;  %839 = vmatprep.subr.bf16.mxu1 %v838_v10  ;;  %v850_v19 = vpack.c.bf16 %v416_v18, %v415_v17  ;;  %v854_v22 = vpack.c.bf16 %v418_v21, %v417_v20  ;;  %v419_v23 = vld [vmem:[#allocation2 + $0x50] sm:$0xff]  ;;  %v420_v24 = vld [vmem:[#allocation2 + $0x58] sm:$0xff]  ;;  %v421_v26 = vld [vmem:[#allocation2 + $0x60] sm:$0xff]  ;;  %s310_s14 = scalar_lea.vmem %s1182_s7, %s697_s28 }
  0x48   : > { %v312_v5 = vld [vmem:[%s304_s16] sm:$0xff]  ;;  %841 = vmatpush3.bf16.msra.mxu1 %v838_v10  ;;  %v313_v16 = vld [vmem:[%s304_s16 + $0x8] sm:$0xff]  ;;  %v858_v25 = vpack.c.bf16 %v420_v24, %v419_v23  ;;  %v423_v29 = vld [vmem:[#allocation2 + $0x70] sm:$0xff] }
  0x49   : > { %757 = vmatprep.mubr.msk.f32.mxu0 %vm325_vm0, %v312_v5  ;;  %843 = vmatprep.subr.bf16.mxu1 %v842_v12  ;;  %v422_v27 = vld [vmem:[#allocation2 + $0x68] sm:$0xff]  ;;  %v424_v30 = vld [vmem:[#allocation2 + $0x78] sm:$0xff]  ;;  %v509_v32 = vld [vmem:[#allocation4] sm:$0xff] }
  0x4a   : > { %837 = vmatpush3.bf16.msra.mxu0 %v834_v6  ;;  %v862_v28 = vpack.c.bf16 %v422_v27, %v421_v26  ;;  %v866_v31 = vpack.c.bf16 %v424_v30, %v423_v29  ;;  %v510_v33 = vld [vmem:[#allocation4 + $0x8] sm:$0xff]  ;;  %v511_v34 = vld [vmem:[#allocation4 + $0x10] sm:$0xff]  ;;  %v512_v36 = vld [vmem:[#allocation4 + $0x18] sm:$0xff] }
  0x4b   : > { %v870_v35 = vpack.c.bf16 %v510_v33, %v509_v32  ;;  %v874_v37 = vpack.c.bf16 %v512_v36, %v511_v34  ;;  %v513_v38 = vld [vmem:[#allocation4 + $0x20] sm:$0xff]  ;;  %v514_v39 = vld [vmem:[#allocation4 + $0x28] sm:$0xff]  ;;  %v515_v41 = vld [vmem:[#allocation4 + $0x30] sm:$0xff] }
  0x4c   : > { %845 = vmatpush3.bf16.msra.mxu1 %v842_v12  ;;  %v878_v40 = vpack.c.bf16 %v514_v39, %v513_v38  ;;  %v516_v42 = vld [vmem:[#allocation4 + $0x38] sm:$0xff]  ;;  %v517_v44 = vld [vmem:[#allocation4 + $0x40] sm:$0xff]  ;;  %v518_v45 = vld [vmem:[#allocation4 + $0x48] sm:$0xff] }
  0x4d   : > { %758 = vmatmul.mubr.msk.f32.vlgmr.msra.gmra.mrb[0].mxu0 %vm325_vm0, %v313_v16  ;;  %847 = vmatprep.subr.bf16.mxu1 %v846_v15  ;;  %v882_v43 = vpack.c.bf16 %v516_v42, %v515_v41  ;;  %v886_v46 = vpack.c.bf16 %v518_v45, %v517_v44  ;;  %v519_v47 = vld [vmem:[#allocation4 + $0x50] sm:$0xff]  ;;  %v520_v48 = vld [vmem:[#allocation4 + $0x58] sm:$0xff]  ;;  %v521_v50 = vld [vmem:[#allocation4 + $0x60] sm:$0xff] }
  0x4e   : > { %871 = vmatprep.subr.bf16.mxu0 %v870_v35  ;;  %v890_v49 = vpack.c.bf16 %v520_v48, %v519_v47  ;;  %v522_v51 = vld [vmem:[#allocation4 + $0x68] sm:$0xff]  ;;  %v700_v53 = vld [vmem:[%s1177_s2] ss:$0 sm:$0xff]  ;;  %v523_v60 = vld [vmem:[#allocation4 + $0x70] sm:$0xff] }
  0x4f   : > { %873 = vmatpush3.bf16.msra.mxu0 %v870_v35  ;;  %v894_v52 = vpack.c.bf16 %v522_v51, %v521_v50  ;;  %v524_v61 = vld [vmem:[#allocation4 + $0x78] sm:$0xff]  ;;  %v703_v63 = vld [vmem:[%s1179_s4] ss:$0 sm:$0xff] }
  0x50   : > { %849 = vmatpush3.bf16.msra.mxu1 %v846_v15  ;;  %875 = vmatprep.subr.bf16.mxu0 %v874_v37  ;;  %v898_v62 = vpack.c.bf16 %v524_v61, %v523_v60  ;;  %v704_v6 = vld [vmem:[%s1181_s6] ss:$0 sm:$0xff] }
  0x51   : > { %851 = vmatprep.subr.bf16.mxu1 %v850_v19 }
  0x53   : > { %877 = vmatpush3.bf16.msra.mxu0 %v874_v37 }
  0x54   : > { %853 = vmatpush3.bf16.msra.mxu1 %v850_v19  ;;  %879 = vmatprep.subr.bf16.mxu0 %v878_v40 }
  0x55   : > { %855 = vmatprep.subr.bf16.mxu1 %v854_v22 }
  0x57   : > { %881 = vmatpush3.bf16.msra.mxu0 %v878_v40 }
  0x58   : > { %857 = vmatpush3.bf16.msra.mxu1 %v854_v22  ;;  %883 = vmatprep.subr.bf16.mxu0 %v882_v43 }
  0x59   : > { %859 = vmatprep.subr.bf16.mxu1 %v858_v25 }
  0x5b   : > { %885 = vmatpush3.bf16.msra.mxu0 %v882_v43 }
  0x5c   : > { %861 = vmatpush3.bf16.msra.mxu1 %v858_v25  ;;  %887 = vmatprep.subr.bf16.mxu0 %v886_v46 }
  0x5d   : > { %863 = vmatprep.subr.bf16.mxu1 %v862_v28 }
  0x5f   : > { %889 = vmatpush3.bf16.msra.mxu0 %v886_v46 }
  0x60   : > { %865 = vmatpush3.bf16.msra.mxu1 %v862_v28  ;;  %891 = vmatprep.subr.bf16.mxu0 %v890_v49 }
  0x61   : > { %867 = vmatprep.subr.bf16.mxu1 %v866_v31 }
  0x63   : > { %893 = vmatpush3.bf16.msra.mxu0 %v890_v49 }
  0x64   : > { %869 = vmatpush3.bf16.msra.mxu1 %v866_v31  ;;  %895 = vmatprep.subr.bf16.mxu0 %v894_v52 }
  0x67   : > { %897 = vmatpush3.bf16.msra.mxu0 %v894_v52 }
  0x68   : > { %899 = vmatprep.subr.bf16.mxu0 %v898_v62 }
  0x6b   : > { %901 = vmatpush3.bf16.msra.mxu0 %v898_v62 }
 0x120   : > { %v759_v54 = vpop.f32.mrb[0].mxu0 }
 0x121   : > { %v404_v55 = vadd.f32 %v759_v54, %v700_v53  ;;  %v398_v56 = vpop.f32.mrb[1].mxu0 }
 0x122   : > { %v399_v57 = vadd.f32 %v700_v53, %v398_v56 }
 0x123   : > { %v408_v59 = vmax.f32 %v404_v55, 0.0 }
 0x124   : > { %v407_v58 = vmax.f32 %v399_v57, 0.0 }
 0x126   : > { %792 = vmatprep.mubr.f32.mxu1 %v407_v58 }
 0x127   : > { %793 = vmatmul.mubr.f32.vlgmr.msra.gmra.mrb[0].mxu1 %v408_v59 }
 0x1fa   : > { %v794_v0 = vpop.f32.mrb[0].mxu1 }
 0x1fb   : > { %v504_v1 = vadd.f32 %v794_v0, %v703_v63  ;;  %v498_v2 = vpop.f32.mrb[1].mxu1 }
 0x1fc   : > { %v499_v3 = vadd.f32 %v703_v63, %v498_v2 }
 0x1fd   : > { %v508_v5 = vmax.f32 %v504_v1, 0.0 }
 0x1fe   : > { %v507_v4 = vmax.f32 %v499_v3, 0.0 }
 0x200   : > { %827 = vmatprep.mubr.f32.mxu0 %v507_v4 }
 0x201   : > { %828 = vmatmul.mubr.f32.vlgmr.msra.gmra.mrb[2].mxu0 %v508_v5 }
 0x2d4   : > { %v829_v7 = vpop.f32.mrb[2].mxu0 }
 0x2d5   : > { %v598_v8 = vpop.f32.mrb[3].mxu0  ;;  %v604_v10 = vadd.f32 %v829_v7, %v704_v6 }
 0x2d6   : > { %v599_v9 = vadd.f32 %v704_v6, %v598_v8 }
 0x2d7   : > { %608 = vst [vmem:[%s310_s14 + $0x8] sm:$0xff] %v604_v10 }
 0x2d8   : > { %607 = vst [vmem:[%s310_s14] sm:$0xff] %v599_v9 }
 0x2d9 PF: > { %s19_s24 = sadd.s32 1, %s1003_s24  }
 0x2da   : > { %p16_p5 = scmp.ge.s32.totalorder %s19_s24, 4  }
 0x2dc   :  { %18 = sbr.rel (!%p16_p5) target bundleno = 2 (0x2), region = 87 }
 0x2e3   :  { %631 = vsyncpa [#allocation3], 1 }
 0x2e4   :  { %633 = vsyncpa [#allocation3 + $0x1], 1 }
 0x2e5   :  { %634 = vsyncpa [#allocation5], 1 }

</bundles_post_ra>
